<compile_context>
chip_gen: v5e
topology: v5e:2x2
jax: 0.10.0
libtpu: 0.0.40
codegen_flags: <defaults>
</compile_context>

<pallas_src>
import functools

import jax
import jax.numpy as jnp
from jax.experimental import pallas as pl
from jax.experimental.pallas import tpu as pltpu


# ----------------------------------------------------------------------------
# Pallas kernel: one (corner, mode-tile) block of the complex channel contraction
# ----------------------------------------------------------------------------
_CO_CHUNK = 8  # one f32 sublane group: acc_r + acc_i for a (1, 8, Mt) sub-tile
               # stay <= ~8 vregs even at Mt = 512.


def _spectral_corner_kernel(xr_ref, xi_ref, wr_ref, wi_ref, or_ref, oi_ref):
    # Block shapes (corner axis squeezed out):
    #   xr/xi : (Ci, B,  Mt)    wr/wi : (Ci, Co, Mt)    or/oi : (B, Co, Mt)
    ci, b, mt = xr_ref.shape
    co = wr_ref.shape[1]

    # Register-resident accumulation: output is tiled into (1 batch, <=8 Co, Mt)
    # sub-tiles; the Ci reduction is innermost and each sub-tile is written to
    # or_ref/oi_ref exactly once (no per-Ci accumulator store/reload).
    for bb in range(b):
        for oc in range(0, co, _CO_CHUNK):
            sz = min(_CO_CHUNK, co - oc)
            acc_r = jnp.zeros((sz, mt), jnp.float32)
            acc_i = jnp.zeros((sz, mt), jnp.float32)
            for i in range(ci):
                xr = xr_ref[i, bb:bb + 1, :].astype(jnp.float32)    # (1, Mt)
                xi = xi_ref[i, bb:bb + 1, :].astype(jnp.float32)
                wr = wr_ref[i, oc:oc + sz, :].astype(jnp.float32)   # (sz, Mt)
                wi = wi_ref[i, oc:oc + sz, :].astype(jnp.float32)
                # 3-multiply complex product: real = k1 - k3, imag = k1 + k2
                k1 = wr * (xr + xi)
                k2 = xr * (wi - wr)
                k3 = xi * (wr + wi)
                acc_r = acc_r + (k1 - k3)
                acc_i = acc_i + (k1 + k2)
            or_ref[bb, oc:oc + sz, :] = acc_r.astype(or_ref.dtype)
            oi_ref[bb, oc:oc + sz, :] = acc_i.astype(oi_ref.dtype)


def _corner_batchmul(xr, xi, wr, wi, *, mode_tile, vmem_limit_bytes=None):
    """xr/xi: (4, Ci, B, Mp); wr/wi: (4, Ci, Co, Mp) -> 2 x (4, B, Co, Mp) f32.

    out[c, b, o, m] = sum_i x[c, i, b, m] * w[c, i, o, m]   (complex arithmetic)
    """
    n_corner, Ci, B, Mp = xr.shape
    Co = wr.shape[2]
    assert Mp % mode_tile == 0 and mode_tile % 128 == 0

    x_spec = pl.BlockSpec((None, Ci, B, mode_tile), lambda c, m: (c, 0, 0, m))
    w_spec = pl.BlockSpec((None, Ci, Co, mode_tile), lambda c, m: (c, 0, 0, m))
    o_spec = pl.BlockSpec((None, B, Co, mode_tile), lambda c, m: (c, 0, 0, m))

    out_shape = (
        jax.ShapeDtypeStruct((n_corner, B, Co, Mp), jnp.float32),
        jax.ShapeDtypeStruct((n_corner, B, Co, Mp), jnp.float32),
    )

    # Advisory cost: ~3 mul + 7 add per (corner, b, i, o, mode) element.
    flops = 10 * n_corner * B * Ci * Co * Mp
    bytes_accessed = int(
        (xr.size + xi.size) * xr.dtype.itemsize
        + (wr.size + wi.size) * wr.dtype.itemsize
        + 2 * n_corner * B * Co * Mp * 4
    )

    return pl.pallas_call(
        _spectral_corner_kernel,
        out_shape=out_shape,
        grid_spec=pltpu.PrefetchScalarGridSpec(
            num_scalar_prefetch=0,
            grid=(n_corner, Mp // mode_tile),
            in_specs=[x_spec, x_spec, w_spec, w_spec],
            out_specs=[o_spec, o_spec],
        ),
        compiler_params=pltpu.CompilerParams(
            # Both axes are independent; on v7x this shards across the 2 TCs.
            dimension_semantics=("parallel", "parallel"),
            vmem_limit_bytes=vmem_limit_bytes,
        ),
        cost_estimate=pl.CostEstimate(
            flops=flops, transcendentals=0, bytes_accessed=bytes_accessed
        ),
    )(xr, xi, wr, wi)


# ----------------------------------------------------------------------------
# Host-side glue
# ----------------------------------------------------------------------------
def _round_up(a, b):
    return (a + b - 1) // b * b


def choose_tiling(modes, batch, in_channels, out_channels, *,
                  x_bytes=4, w_bytes=4, max_mode_tile=512,
                  vmem_budget_bytes=40 << 20):
    """Pick (mode_tile, mode_pad, vmem_limit_bytes) for the kernel.

    The flattened mode axis M is padded to Mp = round_up(M, 128) first; the
    tile is the largest multiple-of-128 divisor of Mp that is <= max_mode_tile
    AND keeps the double-buffered per-step footprint
        2 * Mt * (2*Ci*B*x_bytes + 2*Ci*Co*w_bytes + 2*B*Co*4)
    under vmem_budget_bytes (default 40 MiB — fits v7x's 64 MiB VMEM with
    headroom; v5e/v6e's 128 MiB has far more slack).  The returned VMEM limit
    is always explicit because the scoped default (16 MiB on v5e, 32 MiB on
    v6e/v7x) can be smaller than the double-buffered blocks.
    """
    assert max_mode_tile % 128 == 0
    m = modes[0] * modes[1] * modes[2]
    mp = _round_up(m, 128)
    n128 = mp // 128
    per_col = 2 * 128 * (2 * in_channels * batch * x_bytes
                         + 2 * in_channels * out_channels * w_bytes
                         + 2 * batch * out_channels * 4)
    max_cols = min(max_mode_tile // 128, n128,
                   max(1, vmem_budget_bytes // max(per_col, 1)))
    cols = 1
    for d in range(1, max_cols + 1):
        if n128 % d == 0:
            cols = d
    mode_tile = cols * 128
    footprint = per_col * cols
    vmem_limit = int(min(max(footprint + (16 << 20), 32 << 20), 60 << 20))
    return mode_tile, mp, vmem_limit


def pack_spectral_weights(weights, modes, mode_pad, dtype=jnp.float32):
    """Pre-pack the 4 weight tensors (Ci, Co, m1, m2, m3, 2) once into padded
    (4, Ci, Co, Mp) real / imag planes (constants across forward calls).
    Pass dtype=jnp.bfloat16 on v6e/v7x to halve the dominant weight DMA stream
    (accumulation in-kernel stays float32)."""
    m1, m2, m3 = modes
    ci, co = weights[0].shape[0], weights[0].shape[1]
    m = m1 * m2 * m3
    w = jnp.stack(weights, axis=0)                         # (4, Ci, Co, m1, m2, m3, 2)
    wr = w[..., 0].reshape(4, ci, co, m)
    wi = w[..., 1].reshape(4, ci, co, m)
    pad = mode_pad - m
    if pad:
        wr = jnp.pad(wr, ((0, 0), (0, 0), (0, 0), (0, pad)))
        wi = jnp.pad(wi, ((0, 0), (0, 0), (0, 0), (0, pad)))
    return wr.astype(dtype), wi.astype(dtype)


def spectral_conv3d(x, wr, wi, *, modes, mode_tile, input_dtype=jnp.float32,
                    vmem_limit_bytes=None):
    """Forward pass of SpectralConv3d.

    x:       (B, Ci, D1, D2, D3) float32
    wr, wi:  packed weights from pack_spectral_weights, each (4, Ci, Co, Mp)
    modes:   (m1, m2, m3)
    returns: (B, Co, D1, D2, D3) float32
    """
    m1, m2, m3 = modes
    B, Ci, D1, D2, D3 = x.shape
    Co = wr.shape[2]
    M = m1 * m2 * m3
    Mp = wr.shape[3]
    D3r = D3 // 2 + 1
    assert m1 <= D1 and m2 <= D2 and m3 <= D3r, "retained modes exceed spectrum"

    # TODO(synk): rfftn/irfftn have no Pallas equivalent; they run as XLA TPU FFT ops.
    x_ft = jnp.fft.rfftn(x.astype(jnp.float32), axes=(-3, -2, -1))  # complex64

    # Gather the 4 retained-mode corners (same order as the PyTorch code)
    # straight into the padded (4, Ci, B, Mp) real/imag kernel inputs:
    # per-corner slice + direct write, no big stack -> transpose -> pad chain.
    corner_slices = (
        (slice(None), slice(None), slice(0, m1), slice(0, m2), slice(0, m3)),
        (slice(None), slice(None), slice(D1 - m1, D1), slice(0, m2), slice(0, m3)),
        (slice(None), slice(None), slice(0, m1), slice(D2 - m2, D2), slice(0, m3)),
        (slice(None), slice(None), slice(D1 - m1, D1), slice(D2 - m2, D2), slice(0, m3)),
    )
    xr = jnp.zeros((4, Ci, B, Mp), input_dtype)
    xi = jnp.zeros((4, Ci, B, Mp), input_dtype)
    for c, sl in enumerate(corner_slices):
        corner = jnp.transpose(x_ft[sl], (1, 0, 2, 3, 4)).reshape(Ci, B, M)
        xr = xr.at[c, :, :, :M].set(jnp.real(corner).astype(input_dtype))
        xi = xi.at[c, :, :, :M].set(jnp.imag(corner).astype(input_dtype))

    out_r, out_i = _corner_batchmul(
        xr, xi, wr, wi, mode_tile=mode_tile, vmem_limit_bytes=vmem_limit_bytes
    )                                                      # 2 x (4, B, Co, Mp) f32

    out_c = (out_r[..., :M] + 1j * out_i[..., :M]).astype(jnp.complex64)
    out_c = out_c.reshape(4, B, Co, m1, m2, m3)

    # Scatter the 4 corners into the zero spectrum in the SAME write order as the
    # PyTorch in-place assignments (matters only if corners overlap, 2*m > D).
    out_ft = jnp.zeros((B, Co, D1, D2, D3r), dtype=jnp.complex64)
    out_ft = out_ft.at[:, :, :m1, :m2, :m3].set(out_c[0])
    out_ft = out_ft.at[:, :, -m1:, :m2, :m3].set(out_c[1])
    out_ft = out_ft.at[:, :, :m1, -m2:, :m3].set(out_c[2])
    out_ft = out_ft.at[:, :, -m1:, -m2:, :m3].set(out_c[3])

    return jnp.fft.irfftn(out_ft, s=(D1, D2, D3), axes=(-3, -2, -1)).astype(jnp.float32)


# ----------------------------------------------------------------------------
# Pure-JAX reference (mirrors the PyTorch module exactly)
# ----------------------------------------------------------------------------
def _reference_spectral_conv3d(x, weights, modes):
    m1, m2, m3 = modes
    B, Ci, D1, D2, D3 = x.shape
    Co = weights[0].shape[1]
    x_ft = jnp.fft.rfftn(x, axes=(-3, -2, -1))
    wc = [w[..., 0] + 1j * w[..., 1] for w in weights]
    bm = lambda a, w: jnp.einsum("bixyz,ioxyz->boxyz", a, w)
    out_ft = jnp.zeros((B, Co, D1, D2, D3 // 2 + 1), jnp.complex64)
    out_ft = out_ft.at[:, :, :m1, :m2, :m3].set(bm(x_ft[:, :, :m1, :m2, :m3], wc[0]))
    out_ft = out_ft.at[:, :, -m1:, :m2, :m3].set(bm(x_ft[:, :, -m1:, :m2, :m3], wc[1]))
    out_ft = out_ft.at[:, :, :m1, -m2:, :m3].set(bm(x_ft[:, :, :m1, -m2:, :m3], wc[2]))
    out_ft = out_ft.at[:, :, -m1:, -m2:, :m3].set(bm(x_ft[:, :, -m1:, -m2:, :m3], wc[3]))
    return jnp.fft.irfftn(out_ft, s=(D1, D2, D3), axes=(-3, -2, -1)).astype(jnp.float32)


if __name__ == "__main__":
    # Small, module-consistent shapes.
    B, Ci, Co = 2, 4, 4
    D1, D2, D3 = 8, 8, 8
    m1, m2, m3 = 3, 3, 3
    modes = (m1, m2, m3)

    key = jax.random.PRNGKey(0)
    kx, k1, k2, k3, k4 = jax.random.split(key, 5)

    x = jax.random.normal(kx, (B, Ci, D1, D2, D3), dtype=jnp.float32)

    # Deterministic parameter init matching the module: scale * U[0,1),
    # shape (Ci, Co, m1, m2, m3, 2) per weight tensor.
    scale = 1.0 / (Ci * Co)
    wshape = (Ci, Co, m1, m2, m3, 2)
    weights = tuple(
        scale * jax.random.uniform(k, wshape, dtype=jnp.float32)
        for k in (k1, k2, k3, k4)
    )

    # Footprint-derived tiling (divisor-based mode padding) + explicit VMEM limit.
    mode_tile, mode_pad, vmem_limit = choose_tiling(modes, B, Ci, Co)

    # For HBM-bound regimes on v6e/v7x pass dtype=jnp.bfloat16 here (and
    # input_dtype=jnp.bfloat16 below) to halve the dominant weight stream;
    # keep f32 on v5e unless profiling shows the weight DMA exposed.
    wr_packed, wi_packed = pack_spectral_weights(weights, modes, mode_pad,
                                                 dtype=jnp.float32)

    fwd = jax.jit(functools.partial(spectral_conv3d, modes=modes,
                                    mode_tile=mode_tile,
                                    vmem_limit_bytes=vmem_limit))
    out = jax.block_until_ready(fwd(x, wr_packed, wi_packed))
    assert out.shape == (B, Co, D1, D2, D3), out.shape

    # Sanity-check the full forward pass against a pure-JAX reference.
    ref = jax.block_until_ready(_reference_spectral_conv3d(x, weights, modes))
    err = float(jnp.max(jnp.abs(out - ref)))
    assert jnp.allclose(out, ref, atol=1e-4, rtol=1e-4), err

    print("KERNEL_OK")
</pallas_src>

<mosaic_0001>
module attributes {stable_mosaic.version = 11 : i64} {
  func.func @_spectral_corner_kernel(%arg0: i32, %arg1: i32, %arg2: memref<1x4x2x128xf32, #tpu.memory_space<vmem>>, %arg3: memref<1x4x2x128xf32, #tpu.memory_space<vmem>>, %arg4: memref<1x4x4x128xf32, #tpu.memory_space<vmem>>, %arg5: memref<1x4x4x128xf32, #tpu.memory_space<vmem>>, %arg6: memref<1x2x4x128xf32, #tpu.memory_space<vmem>>, %arg7: memref<1x2x4x128xf32, #tpu.memory_space<vmem>>) attributes {dimension_semantics = [#tpu.dimension_semantics<parallel>, #tpu.dimension_semantics<parallel>], iteration_bounds = array<i64: 4, 1>, scalar_prefetch = 0 : i64, scratch_operands = 0 : i64, tpu.core_type = #tpu.core_type<tc>, window_params = [{transform_indices = @transform_0, window_bounds = array<i64: 1, 4, 2, 128>}, {transform_indices = @transform_1, window_bounds = array<i64: 1, 4, 2, 128>}, {transform_indices = @transform_2, window_bounds = array<i64: 1, 4, 4, 128>}, {transform_indices = @transform_3, window_bounds = array<i64: 1, 4, 4, 128>}, {transform_indices = @transform_4, window_bounds = array<i64: 1, 2, 4, 128>}, {transform_indices = @transform_5, window_bounds = array<i64: 1, 2, 4, 128>}]} {
    %cst = arith.constant 0.000000e+00 : f32
    %0 = vector.broadcast %cst : f32 to vector<4x128xf32>
    %cst_0 = arith.constant 0.000000e+00 : f32
    %1 = vector.broadcast %cst_0 : f32 to vector<4x128xf32>
    %c0 = arith.constant 0 : index
    %c0_1 = arith.constant 0 : index
    %c0_2 = arith.constant 0 : index
    %c0_3 = arith.constant 0 : index
    %2 = vector.load %arg2[%c0, %c0_1, %c0_2, %c0_3] : memref<1x4x2x128xf32, #tpu.memory_space<vmem>>, vector<1x1x1x128xf32>
    %3 = vector.shape_cast %2 : vector<1x1x1x128xf32> to vector<1x128xf32>
    %c0_4 = arith.constant 0 : index
    %c0_5 = arith.constant 0 : index
    %c0_6 = arith.constant 0 : index
    %c0_7 = arith.constant 0 : index
    %4 = vector.load %arg3[%c0_4, %c0_5, %c0_6, %c0_7] : memref<1x4x2x128xf32, #tpu.memory_space<vmem>>, vector<1x1x1x128xf32>
    %5 = vector.shape_cast %4 : vector<1x1x1x128xf32> to vector<1x128xf32>
    %c0_8 = arith.constant 0 : index
    %c0_9 = arith.constant 0 : index
    %c0_10 = arith.constant 0 : index
    %c0_11 = arith.constant 0 : index
    %6 = vector.load %arg4[%c0_8, %c0_9, %c0_10, %c0_11] : memref<1x4x4x128xf32, #tpu.memory_space<vmem>>, vector<1x1x4x128xf32>
    %7 = vector.shape_cast %6 : vector<1x1x4x128xf32> to vector<4x128xf32>
    %c0_12 = arith.constant 0 : index
    %c0_13 = arith.constant 0 : index
    %c0_14 = arith.constant 0 : index
    %c0_15 = arith.constant 0 : index
    %8 = vector.load %arg5[%c0_12, %c0_13, %c0_14, %c0_15] : memref<1x4x4x128xf32, #tpu.memory_space<vmem>>, vector<1x1x4x128xf32>
    %9 = vector.shape_cast %8 : vector<1x1x4x128xf32> to vector<4x128xf32>
    %10 = arith.addf %3, %5 : vector<1x128xf32>
    %11 = vector.broadcast %10 : vector<1x128xf32> to vector<4x128xf32>
    %12 = arith.mulf %7, %11 : vector<4x128xf32>
    %13 = arith.subf %9, %7 : vector<4x128xf32>
    %14 = vector.broadcast %3 : vector<1x128xf32> to vector<4x128xf32>
    %15 = arith.mulf %14, %13 : vector<4x128xf32>
    %16 = arith.addf %7, %9 : vector<4x128xf32>
    %17 = vector.broadcast %5 : vector<1x128xf32> to vector<4x128xf32>
    %18 = arith.mulf %17, %16 : vector<4x128xf32>
    %19 = arith.subf %12, %18 : vector<4x128xf32>
    %20 = arith.addf %0, %19 : vector<4x128xf32>
    %21 = arith.addf %12, %15 : vector<4x128xf32>
    %22 = arith.addf %1, %21 : vector<4x128xf32>
    %c0_16 = arith.constant 0 : index
    %c1 = arith.constant 1 : index
    %c0_17 = arith.constant 0 : index
    %c0_18 = arith.constant 0 : index
    %23 = vector.load %arg2[%c0_16, %c1, %c0_17, %c0_18] : memref<1x4x2x128xf32, #tpu.memory_space<vmem>>, vector<1x1x1x128xf32>
    %24 = vector.shape_cast %23 : vector<1x1x1x128xf32> to vector<1x128xf32>
    %c0_19 = arith.constant 0 : index
    %c1_20 = arith.constant 1 : index
    %c0_21 = arith.constant 0 : index
    %c0_22 = arith.constant 0 : index
    %25 = vector.load %arg3[%c0_19, %c1_20, %c0_21, %c0_22] : memref<1x4x2x128xf32, #tpu.memory_space<vmem>>, vector<1x1x1x128xf32>
    %26 = vector.shape_cast %25 : vector<1x1x1x128xf32> to vector<1x128xf32>
    %c0_23 = arith.constant 0 : index
    %c1_24 = arith.constant 1 : index
    %c0_25 = arith.constant 0 : index
    %c0_26 = arith.constant 0 : index
    %27 = vector.load %arg4[%c0_23, %c1_24, %c0_25, %c0_26] : memref<1x4x4x128xf32, #tpu.memory_space<vmem>>, vector<1x1x4x128xf32>
    %28 = vector.shape_cast %27 : vector<1x1x4x128xf32> to vector<4x128xf32>
    %c0_27 = arith.constant 0 : index
    %c1_28 = arith.constant 1 : index
    %c0_29 = arith.constant 0 : index
    %c0_30 = arith.constant 0 : index
    %29 = vector.load %arg5[%c0_27, %c1_28, %c0_29, %c0_30] : memref<1x4x4x128xf32, #tpu.memory_space<vmem>>, vector<1x1x4x128xf32>
    %30 = vector.shape_cast %29 : vector<1x1x4x128xf32> to vector<4x128xf32>
    %31 = arith.addf %24, %26 : vector<1x128xf32>
    %32 = vector.broadcast %31 : vector<1x128xf32> to vector<4x128xf32>
    %33 = arith.mulf %28, %32 : vector<4x128xf32>
    %34 = arith.subf %30, %28 : vector<4x128xf32>
    %35 = vector.broadcast %24 : vector<1x128xf32> to vector<4x128xf32>
    %36 = arith.mulf %35, %34 : vector<4x128xf32>
    %37 = arith.addf %28, %30 : vector<4x128xf32>
    %38 = vector.broadcast %26 : vector<1x128xf32> to vector<4x128xf32>
    %39 = arith.mulf %38, %37 : vector<4x128xf32>
    %40 = arith.subf %33, %39 : vector<4x128xf32>
    %41 = arith.addf %20, %40 : vector<4x128xf32>
    %42 = arith.addf %33, %36 : vector<4x128xf32>
    %43 = arith.addf %22, %42 : vector<4x128xf32>
    %c0_31 = arith.constant 0 : index
    %c2 = arith.constant 2 : index
    %c0_32 = arith.constant 0 : index
    %c0_33 = arith.constant 0 : index
    %44 = vector.load %arg2[%c0_31, %c2, %c0_32, %c0_33] : memref<1x4x2x128xf32, #tpu.memory_space<vmem>>, vector<1x1x1x128xf32>
    %45 = vector.shape_cast %44 : vector<1x1x1x128xf32> to vector<1x128xf32>
    %c0_34 = arith.constant 0 : index
    %c2_35 = arith.constant 2 : index
    %c0_36 = arith.constant 0 : index
    %c0_37 = arith.constant 0 : index
    %46 = vector.load %arg3[%c0_34, %c2_35, %c0_36, %c0_37] : memref<1x4x2x128xf32, #tpu.memory_space<vmem>>, vector<1x1x1x128xf32>
    %47 = vector.shape_cast %46 : vector<1x1x1x128xf32> to vector<1x128xf32>
    %c0_38 = arith.constant 0 : index
    %c2_39 = arith.constant 2 : index
    %c0_40 = arith.constant 0 : index
    %c0_41 = arith.constant 0 : index
    %48 = vector.load %arg4[%c0_38, %c2_39, %c0_40, %c0_41] : memref<1x4x4x128xf32, #tpu.memory_space<vmem>>, vector<1x1x4x128xf32>
    %49 = vector.shape_cast %48 : vector<1x1x4x128xf32> to vector<4x128xf32>
    %c0_42 = arith.constant 0 : index
    %c2_43 = arith.constant 2 : index
    %c0_44 = arith.constant 0 : index
    %c0_45 = arith.constant 0 : index
    %50 = vector.load %arg5[%c0_42, %c2_43, %c0_44, %c0_45] : memref<1x4x4x128xf32, #tpu.memory_space<vmem>>, vector<1x1x4x128xf32>
    %51 = vector.shape_cast %50 : vector<1x1x4x128xf32> to vector<4x128xf32>
    %52 = arith.addf %45, %47 : vector<1x128xf32>
    %53 = vector.broadcast %52 : vector<1x128xf32> to vector<4x128xf32>
    %54 = arith.mulf %49, %53 : vector<4x128xf32>
    %55 = arith.subf %51, %49 : vector<4x128xf32>
    %56 = vector.broadcast %45 : vector<1x128xf32> to vector<4x128xf32>
    %57 = arith.mulf %56, %55 : vector<4x128xf32>
    %58 = arith.addf %49, %51 : vector<4x128xf32>
    %59 = vector.broadcast %47 : vector<1x128xf32> to vector<4x128xf32>
    %60 = arith.mulf %59, %58 : vector<4x128xf32>
    %61 = arith.subf %54, %60 : vector<4x128xf32>
    %62 = arith.addf %41, %61 : vector<4x128xf32>
    %63 = arith.addf %54, %57 : vector<4x128xf32>
    %64 = arith.addf %43, %63 : vector<4x128xf32>
    %c0_46 = arith.constant 0 : index
    %c3 = arith.constant 3 : index
    %c0_47 = arith.constant 0 : index
    %c0_48 = arith.constant 0 : index
    %65 = vector.load %arg2[%c0_46, %c3, %c0_47, %c0_48] : memref<1x4x2x128xf32, #tpu.memory_space<vmem>>, vector<1x1x1x128xf32>
    %66 = vector.shape_cast %65 : vector<1x1x1x128xf32> to vector<1x128xf32>
    %c0_49 = arith.constant 0 : index
    %c3_50 = arith.constant 3 : index
    %c0_51 = arith.constant 0 : index
    %c0_52 = arith.constant 0 : index
    %67 = vector.load %arg3[%c0_49, %c3_50, %c0_51, %c0_52] : memref<1x4x2x128xf32, #tpu.memory_space<vmem>>, vector<1x1x1x128xf32>
    %68 = vector.shape_cast %67 : vector<1x1x1x128xf32> to vector<1x128xf32>
    %c0_53 = arith.constant 0 : index
    %c3_54 = arith.constant 3 : index
    %c0_55 = arith.constant 0 : index
    %c0_56 = arith.constant 0 : index
    %69 = vector.load %arg4[%c0_53, %c3_54, %c0_55, %c0_56] : memref<1x4x4x128xf32, #tpu.memory_space<vmem>>, vector<1x1x4x128xf32>
    %70 = vector.shape_cast %69 : vector<1x1x4x128xf32> to vector<4x128xf32>
    %c0_57 = arith.constant 0 : index
    %c3_58 = arith.constant 3 : index
    %c0_59 = arith.constant 0 : index
    %c0_60 = arith.constant 0 : index
    %71 = vector.load %arg5[%c0_57, %c3_58, %c0_59, %c0_60] : memref<1x4x4x128xf32, #tpu.memory_space<vmem>>, vector<1x1x4x128xf32>
    %72 = vector.shape_cast %71 : vector<1x1x4x128xf32> to vector<4x128xf32>
    %73 = arith.addf %66, %68 : vector<1x128xf32>
    %74 = vector.broadcast %73 : vector<1x128xf32> to vector<4x128xf32>
    %75 = arith.mulf %70, %74 : vector<4x128xf32>
    %76 = arith.subf %72, %70 : vector<4x128xf32>
    %77 = vector.broadcast %66 : vector<1x128xf32> to vector<4x128xf32>
    %78 = arith.mulf %77, %76 : vector<4x128xf32>
    %79 = arith.addf %70, %72 : vector<4x128xf32>
    %80 = vector.broadcast %68 : vector<1x128xf32> to vector<4x128xf32>
    %81 = arith.mulf %80, %79 : vector<4x128xf32>
    %82 = arith.subf %75, %81 : vector<4x128xf32>
    %83 = arith.addf %62, %82 : vector<4x128xf32>
    %84 = arith.addf %75, %78 : vector<4x128xf32>
    %85 = arith.addf %64, %84 : vector<4x128xf32>
    %c0_61 = arith.constant 0 : index
    %c0_62 = arith.constant 0 : index
    %c0_63 = arith.constant 0 : index
    %c0_64 = arith.constant 0 : index
    %86 = vector.load %arg6[%c0_61, %c0_62, %c0_63, %c0_64] : memref<1x2x4x128xf32, #tpu.memory_space<vmem>>, vector<1x1x4x128xf32>
    %87 = vector.shape_cast %86 : vector<1x1x4x128xf32> to vector<4x128xf32>
    %88 = vector.shape_cast %83 : vector<4x128xf32> to vector<1x1x4x128xf32>
    tpu.vector_store %arg6[%c0_61, %c0_62, %c0_63, %c0_64], %88 {strides = array<i32>} : memref<1x2x4x128xf32, #tpu.memory_space<vmem>>, vector<1x1x4x128xf32>,
    %c0_65 = arith.constant 0 : index
    %c0_66 = arith.constant 0 : index
    %c0_67 = arith.constant 0 : index
    %c0_68 = arith.constant 0 : index
    %89 = vector.load %arg7[%c0_65, %c0_66, %c0_67, %c0_68] : memref<1x2x4x128xf32, #tpu.memory_space<vmem>>, vector<1x1x4x128xf32>
    %90 = vector.shape_cast %89 : vector<1x1x4x128xf32> to vector<4x128xf32>
    %91 = vector.shape_cast %85 : vector<4x128xf32> to vector<1x1x4x128xf32>
    tpu.vector_store %arg7[%c0_65, %c0_66, %c0_67, %c0_68], %91 {strides = array<i32>} : memref<1x2x4x128xf32, #tpu.memory_space<vmem>>, vector<1x1x4x128xf32>,
    %cst_69 = arith.constant 0.000000e+00 : f32
    %92 = vector.broadcast %cst_69 : f32 to vector<4x128xf32>
    %cst_70 = arith.constant 0.000000e+00 : f32
    %93 = vector.broadcast %cst_70 : f32 to vector<4x128xf32>
    %c0_71 = arith.constant 0 : index
    %c0_72 = arith.constant 0 : index
    %c1_73 = arith.constant 1 : index
    %c0_74 = arith.constant 0 : index
    %94 = vector.load %arg2[%c0_71, %c0_72, %c1_73, %c0_74] : memref<1x4x2x128xf32, #tpu.memory_space<vmem>>, vector<1x1x1x128xf32>
    %95 = vector.shape_cast %94 : vector<1x1x1x128xf32> to vector<1x128xf32>
    %c0_75 = arith.constant 0 : index
    %c0_76 = arith.constant 0 : index
    %c1_77 = arith.constant 1 : index
    %c0_78 = arith.constant 0 : index
    %96 = vector.load %arg3[%c0_75, %c0_76, %c1_77, %c0_78] : memref<1x4x2x128xf32, #tpu.memory_space<vmem>>, vector<1x1x1x128xf32>
    %97 = vector.shape_cast %96 : vector<1x1x1x128xf32> to vector<1x128xf32>
    %c0_79 = arith.constant 0 : index
    %c0_80 = arith.constant 0 : index
    %c0_81 = arith.constant 0 : index
    %c0_82 = arith.constant 0 : index
    %98 = vector.load %arg4[%c0_79, %c0_80, %c0_81, %c0_82] : memref<1x4x4x128xf32, #tpu.memory_space<vmem>>, vector<1x1x4x128xf32>
    %99 = vector.shape_cast %98 : vector<1x1x4x128xf32> to vector<4x128xf32>
    %c0_83 = arith.constant 0 : index
    %c0_84 = arith.constant 0 : index
    %c0_85 = arith.constant 0 : index
    %c0_86 = arith.constant 0 : index
    %100 = vector.load %arg5[%c0_83, %c0_84, %c0_85, %c0_86] : memref<1x4x4x128xf32, #tpu.memory_space<vmem>>, vector<1x1x4x128xf32>
    %101 = vector.shape_cast %100 : vector<1x1x4x128xf32> to vector<4x128xf32>
    %102 = arith.addf %95, %97 : vector<1x128xf32>
    %103 = vector.broadcast %102 : vector<1x128xf32> to vector<4x128xf32>
    %104 = arith.mulf %99, %103 : vector<4x128xf32>
    %105 = arith.subf %101, %99 : vector<4x128xf32>
    %106 = vector.broadcast %95 : vector<1x128xf32> to vector<4x128xf32>
    %107 = arith.mulf %106, %105 : vector<4x128xf32>
    %108 = arith.addf %99, %101 : vector<4x128xf32>
    %109 = vector.broadcast %97 : vector<1x128xf32> to vector<4x128xf32>
    %110 = arith.mulf %109, %108 : vector<4x128xf32>
    %111 = arith.subf %104, %110 : vector<4x128xf32>
    %112 = arith.addf %92, %111 : vector<4x128xf32>
    %113 = arith.addf %104, %107 : vector<4x128xf32>
    %114 = arith.addf %93, %113 : vector<4x128xf32>
    %c0_87 = arith.constant 0 : index
    %c1_88 = arith.constant 1 : index
    %c1_89 = arith.constant 1 : index
    %c0_90 = arith.constant 0 : index
    %115 = vector.load %arg2[%c0_87, %c1_88, %c1_89, %c0_90] : memref<1x4x2x128xf32, #tpu.memory_space<vmem>>, vector<1x1x1x128xf32>
    %116 = vector.shape_cast %115 : vector<1x1x1x128xf32> to vector<1x128xf32>
    %c0_91 = arith.constant 0 : index
    %c1_92 = arith.constant 1 : index
    %c1_93 = arith.constant 1 : index
    %c0_94 = arith.constant 0 : index
    %117 = vector.load %arg3[%c0_91, %c1_92, %c1_93, %c0_94] : memref<1x4x2x128xf32, #tpu.memory_space<vmem>>, vector<1x1x1x128xf32>
    %118 = vector.shape_cast %117 : vector<1x1x1x128xf32> to vector<1x128xf32>
    %c0_95 = arith.constant 0 : index
    %c1_96 = arith.constant 1 : index
    %c0_97 = arith.constant 0 : index
    %c0_98 = arith.constant 0 : index
    %119 = vector.load %arg4[%c0_95, %c1_96, %c0_97, %c0_98] : memref<1x4x4x128xf32, #tpu.memory_space<vmem>>, vector<1x1x4x128xf32>
    %120 = vector.shape_cast %119 : vector<1x1x4x128xf32> to vector<4x128xf32>
    %c0_99 = arith.constant 0 : index
    %c1_100 = arith.constant 1 : index
    %c0_101 = arith.constant 0 : index
    %c0_102 = arith.constant 0 : index
    %121 = vector.load %arg5[%c0_99, %c1_100, %c0_101, %c0_102] : memref<1x4x4x128xf32, #tpu.memory_space<vmem>>, vector<1x1x4x128xf32>
    %122 = vector.shape_cast %121 : vector<1x1x4x128xf32> to vector<4x128xf32>
    %123 = arith.addf %116, %118 : vector<1x128xf32>
    %124 = vector.broadcast %123 : vector<1x128xf32> to vector<4x128xf32>
    %125 = arith.mulf %120, %124 : vector<4x128xf32>
    %126 = arith.subf %122, %120 : vector<4x128xf32>
    %127 = vector.broadcast %116 : vector<1x128xf32> to vector<4x128xf32>
    %128 = arith.mulf %127, %126 : vector<4x128xf32>
    %129 = arith.addf %120, %122 : vector<4x128xf32>
    %130 = vector.broadcast %118 : vector<1x128xf32> to vector<4x128xf32>
    %131 = arith.mulf %130, %129 : vector<4x128xf32>
    %132 = arith.subf %125, %131 : vector<4x128xf32>
    %133 = arith.addf %112, %132 : vector<4x128xf32>
    %134 = arith.addf %125, %128 : vector<4x128xf32>
    %135 = arith.addf %114, %134 : vector<4x128xf32>
    %c0_103 = arith.constant 0 : index
    %c2_104 = arith.constant 2 : index
    %c1_105 = arith.constant 1 : index
    %c0_106 = arith.constant 0 : index
    %136 = vector.load %arg2[%c0_103, %c2_104, %c1_105, %c0_106] : memref<1x4x2x128xf32, #tpu.memory_space<vmem>>, vector<1x1x1x128xf32>
    %137 = vector.shape_cast %136 : vector<1x1x1x128xf32> to vector<1x128xf32>
    %c0_107 = arith.constant 0 : index
    %c2_108 = arith.constant 2 : index
    %c1_109 = arith.constant 1 : index
    %c0_110 = arith.constant 0 : index
    %138 = vector.load %arg3[%c0_107, %c2_108, %c1_109, %c0_110] : memref<1x4x2x128xf32, #tpu.memory_space<vmem>>, vector<1x1x1x128xf32>
    %139 = vector.shape_cast %138 : vector<1x1x1x128xf32> to vector<1x128xf32>
    %c0_111 = arith.constant 0 : index
    %c2_112 = arith.constant 2 : index
    %c0_113 = arith.constant 0 : index
    %c0_114 = arith.constant 0 : index
    %140 = vector.load %arg4[%c0_111, %c2_112, %c0_113, %c0_114] : memref<1x4x4x128xf32, #tpu.memory_space<vmem>>, vector<1x1x4x128xf32>
    %141 = vector.shape_cast %140 : vector<1x1x4x128xf32> to vector<4x128xf32>
    %c0_115 = arith.constant 0 : index
    %c2_116 = arith.constant 2 : index
    %c0_117 = arith.constant 0 : index
    %c0_118 = arith.constant 0 : index
    %142 = vector.load %arg5[%c0_115, %c2_116, %c0_117, %c0_118] : memref<1x4x4x128xf32, #tpu.memory_space<vmem>>, vector<1x1x4x128xf32>
    %143 = vector.shape_cast %142 : vector<1x1x4x128xf32> to vector<4x128xf32>
    %144 = arith.addf %137, %139 : vector<1x128xf32>
    %145 = vector.broadcast %144 : vector<1x128xf32> to vector<4x128xf32>
    %146 = arith.mulf %141, %145 : vector<4x128xf32>
    %147 = arith.subf %143, %141 : vector<4x128xf32>
    %148 = vector.broadcast %137 : vector<1x128xf32> to vector<4x128xf32>
    %149 = arith.mulf %148, %147 : vector<4x128xf32>
    %150 = arith.addf %141, %143 : vector<4x128xf32>
    %151 = vector.broadcast %139 : vector<1x128xf32> to vector<4x128xf32>
    %152 = arith.mulf %151, %150 : vector<4x128xf32>
    %153 = arith.subf %146, %152 : vector<4x128xf32>
    %154 = arith.addf %133, %153 : vector<4x128xf32>
    %155 = arith.addf %146, %149 : vector<4x128xf32>
    %156 = arith.addf %135, %155 : vector<4x128xf32>
    %c0_119 = arith.constant 0 : index
    %c3_120 = arith.constant 3 : index
    %c1_121 = arith.constant 1 : index
    %c0_122 = arith.constant 0 : index
    %157 = vector.load %arg2[%c0_119, %c3_120, %c1_121, %c0_122] : memref<1x4x2x128xf32, #tpu.memory_space<vmem>>, vector<1x1x1x128xf32>
    %158 = vector.shape_cast %157 : vector<1x1x1x128xf32> to vector<1x128xf32>
    %c0_123 = arith.constant 0 : index
    %c3_124 = arith.constant 3 : index
    %c1_125 = arith.constant 1 : index
    %c0_126 = arith.constant 0 : index
    %159 = vector.load %arg3[%c0_123, %c3_124, %c1_125, %c0_126] : memref<1x4x2x128xf32, #tpu.memory_space<vmem>>, vector<1x1x1x128xf32>
    %160 = vector.shape_cast %159 : vector<1x1x1x128xf32> to vector<1x128xf32>
    %c0_127 = arith.constant 0 : index
    %c3_128 = arith.constant 3 : index
    %c0_129 = arith.constant 0 : index
    %c0_130 = arith.constant 0 : index
    %161 = vector.load %arg4[%c0_127, %c3_128, %c0_129, %c0_130] : memref<1x4x4x128xf32, #tpu.memory_space<vmem>>, vector<1x1x4x128xf32>
    %162 = vector.shape_cast %161 : vector<1x1x4x128xf32> to vector<4x128xf32>
    %c0_131 = arith.constant 0 : index
    %c3_132 = arith.constant 3 : index
    %c0_133 = arith.constant 0 : index
    %c0_134 = arith.constant 0 : index
    %163 = vector.load %arg5[%c0_131, %c3_132, %c0_133, %c0_134] : memref<1x4x4x128xf32, #tpu.memory_space<vmem>>, vector<1x1x4x128xf32>
    %164 = vector.shape_cast %163 : vector<1x1x4x128xf32> to vector<4x128xf32>
    %165 = arith.addf %158, %160 : vector<1x128xf32>
    %166 = vector.broadcast %165 : vector<1x128xf32> to vector<4x128xf32>
    %167 = arith.mulf %162, %166 : vector<4x128xf32>
    %168 = arith.subf %164, %162 : vector<4x128xf32>
    %169 = vector.broadcast %158 : vector<1x128xf32> to vector<4x128xf32>
    %170 = arith.mulf %169, %168 : vector<4x128xf32>
    %171 = arith.addf %162, %164 : vector<4x128xf32>
    %172 = vector.broadcast %160 : vector<1x128xf32> to vector<4x128xf32>
    %173 = arith.mulf %172, %171 : vector<4x128xf32>
    %174 = arith.subf %167, %173 : vector<4x128xf32>
    %175 = arith.addf %154, %174 : vector<4x128xf32>
    %176 = arith.addf %167, %170 : vector<4x128xf32>
    %177 = arith.addf %156, %176 : vector<4x128xf32>
    %c0_135 = arith.constant 0 : index
    %c1_136 = arith.constant 1 : index
    %c0_137 = arith.constant 0 : index
    %c0_138 = arith.constant 0 : index
    %178 = vector.load %arg6[%c0_135, %c1_136, %c0_137, %c0_138] : memref<1x2x4x128xf32, #tpu.memory_space<vmem>>, vector<1x1x4x128xf32>
    %179 = vector.shape_cast %178 : vector<1x1x4x128xf32> to vector<4x128xf32>
    %180 = vector.shape_cast %175 : vector<4x128xf32> to vector<1x1x4x128xf32>
    tpu.vector_store %arg6[%c0_135, %c1_136, %c0_137, %c0_138], %180 {strides = array<i32>} : memref<1x2x4x128xf32, #tpu.memory_space<vmem>>, vector<1x1x4x128xf32>,
    %c0_139 = arith.constant 0 : index
    %c1_140 = arith.constant 1 : index
    %c0_141 = arith.constant 0 : index
    %c0_142 = arith.constant 0 : index
    %181 = vector.load %arg7[%c0_139, %c1_140, %c0_141, %c0_142] : memref<1x2x4x128xf32, #tpu.memory_space<vmem>>, vector<1x1x4x128xf32>
    %182 = vector.shape_cast %181 : vector<1x1x4x128xf32> to vector<4x128xf32>
    %183 = vector.shape_cast %177 : vector<4x128xf32> to vector<1x1x4x128xf32>
    tpu.vector_store %arg7[%c0_139, %c1_140, %c0_141, %c0_142], %183 {strides = array<i32>} : memref<1x2x4x128xf32, #tpu.memory_space<vmem>>, vector<1x1x4x128xf32>,
    return
  }
  func.func @transform_0(%arg0: i32, %arg1: i32) -> (i32, i32, i32, i32) {
    %c0_i32 = arith.constant 0 : i32
    %c0_i32_0 = arith.constant 0 : i32
    %c0_i32_1 = arith.constant 0 : i32
    return %arg0, %c0_i32, %c0_i32_0, %arg1 : i32, i32, i32, i32
  }
  func.func @transform_1(%arg0: i32, %arg1: i32) -> (i32, i32, i32, i32) {
    %c0_i32 = arith.constant 0 : i32
    %c0_i32_0 = arith.constant 0 : i32
    %c0_i32_1 = arith.constant 0 : i32
    return %arg0, %c0_i32, %c0_i32_0, %arg1 : i32, i32, i32, i32
  }
  func.func @transform_2(%arg0: i32, %arg1: i32) -> (i32, i32, i32, i32) {
    %c0_i32 = arith.constant 0 : i32
    %c0_i32_0 = arith.constant 0 : i32
    %c0_i32_1 = arith.constant 0 : i32
    return %arg0, %c0_i32, %c0_i32_0, %arg1 : i32, i32, i32, i32
  }
  func.func @transform_3(%arg0: i32, %arg1: i32) -> (i32, i32, i32, i32) {
    %c0_i32 = arith.constant 0 : i32
    %c0_i32_0 = arith.constant 0 : i32
    %c0_i32_1 = arith.constant 0 : i32
    return %arg0, %c0_i32, %c0_i32_0, %arg1 : i32, i32, i32, i32
  }
  func.func @transform_4(%arg0: i32, %arg1: i32) -> (i32, i32, i32, i32) {
    %c0_i32 = arith.constant 0 : i32
    %c0_i32_0 = arith.constant 0 : i32
    %c0_i32_1 = arith.constant 0 : i32
    return %arg0, %c0_i32, %c0_i32_0, %arg1 : i32, i32, i32, i32
  }
  func.func @transform_5(%arg0: i32, %arg1: i32) -> (i32, i32, i32, i32) {
    %c0_i32 = arith.constant 0 : i32
    %c0_i32_0 = arith.constant 0 : i32
    %c0_i32_1 = arith.constant 0 : i32
    return %arg0, %c0_i32, %c0_i32_0, %arg1 : i32, i32, i32, i32
  }
}

</mosaic_0001>

<bundles_post_ra>
// kernel: spectral_conv3d.1
= control target key start
LH: loop header
LB: loop body
LE: loop exit
PB: predicated region body
PF: predicated region fallthrough
CT: control target
= control target key end

     0   :  { %s853_s18 = smov 0   ;;  %s855_s19 = smov 0   ;;  %s977_s0 = inlined_call_operand.vmem [shape: f32[4,4,2,128], index: 0, kind: input, shape index: {}]   ;;  %s978_s1 = inlined_call_operand.vmem [shape: f32[4,4,2,128], index: 1, kind: input, shape index: {}]   ;;  %s979_s2 = inlined_call_operand.vmem [shape: f32[4,4,4,128], index: 2, kind: input, shape index: {}]   ;;  %s980_s3 = inlined_call_operand.vmem [shape: f32[4,4,4,128], index: 3, kind: input, shape index: {}]   ;;  %s981_s4 = inlined_call_operand.vmem [shape: f32[4,2,4,128], index: 4, kind: output, shape index: {0}]   ;;  %s982_s5 = inlined_call_operand.vmem [shape: f32[4,2,4,128], index: 5, kind: output, shape index: {1}]  }
   0x1   :  { %s857_s20 = smov 0  }
   0x2 LB: > { %s28_s21 = sadd.s32 1, %s817_s19  ;;  %p712_p0 = scmp.ge.s32.totalorder %s821_s20, 1  ;;  %s821_s20 = sphi %s857_s20, %s16_s20   ;;  %s817_s19 = sphi %s855_s19, %s984_s19   ;;  %s813_s18 = sphi %s853_s18, %s983_s18  }
   0x3   : > { %p30_p1 = scmp.ge.s32.totalorder %s28_s21, 4  ;;  %p256_p2 = scmp.lt.s32.totalorder %s821_s20, 5 }
   0x5   : > { %s986_s21 = smov (%p30_p1, %s28_s21), 0  ;;  %p257_p3 = pnand %p712_p0, %p256_p2 }
   0x6   : > { %p322_p4 = scmp.lt.s32.totalorder (!%p257_p3), %s813_s18, 3 }
   0x7   : > { %260 = sbr.rel (%p257_p3) target bundleno = 46 (0x2e), region = 36 }
   0xc   : > { %s988_s18 = smov (!%p322_p4, %s813_s18), 3 }
   0xd   : > { %s871_s22 = sshll.u32 %s988_s18, 3  ;;  %s755_s23 = sshll.u32 %s988_s18, 4 }
   0xe   : > { %s877_s26 = scalar_lea.vmem %s977_s0, %s871_s22  ;;  %s883_s29 = scalar_lea.vmem %s978_s1, %s871_s22 }
   0xf   : > { %s888_s7 = scalar_lea.vmem %s979_s2, %s755_s23  ;;  %s893_s10 = scalar_lea.vmem %s980_s3, %s755_s23  ;;  %v370_v0 = vld [vmem:[%s877_s26] sm:$0x1]  ;;  %v725_v6 = vld [vmem:[%s877_s26 + $0x2] sm:$0x1]  ;;  %v729_v15 = vld [vmem:[%s877_s26 + $0x4] sm:$0x1] }
  0x10   : > { %v371_v1 = vld [vmem:[%s883_s29] sm:$0x1]  ;;  %v726_v8 = vld [vmem:[%s883_s29 + $0x2] sm:$0x1]  ;;  %v727_v9 = vld [vmem:[%s888_s7 + $0x4] sm:$0xf]  ;;  %s943_s13 = scalar_lea.vmem %s981_s4, %s871_s22  ;;  %s958_s16 = scalar_lea.vmem %s982_s5, %s871_s22 }
  0x11   : > { %v783_v2 = vld [vmem:[%s883_s29] ss:$0 sm:$0xff]  ;;  %v374_v5 = vadd.f32 %v371_v1, %v370_v0  ;;  %v728_v10 = vld [vmem:[%s893_s10 + $0x4] sm:$0xf]  ;;  %v395_v12 = vadd.f32 %v726_v8, %v725_v6  ;;  %v784_v14 = vld [vmem:[%s883_s29 + $0x2] ss:$0 sm:$0xff] }
  0x12   : > { %v372_v3 = vld [vmem:[%s888_s7] sm:$0xf]  ;;  %v401_v13 = vadd.f32 %v728_v10, %v727_v9  ;;  %v730_v17 = vld [vmem:[%s883_s29 + $0x4] sm:$0x1]  ;;  %v731_v18 = vld [vmem:[%s888_s7 + $0x8] sm:$0xf]  ;;  %v398_v31 = vsub.f32 %v728_v10, %v727_v9 }
  0x13   : > { %v373_v4 = vld [vmem:[%s893_s10] sm:$0xf]  ;;  %v375_v11 = vperm.slane %v374_v5, 0  ;;  %v732_v19 = vld [vmem:[%s893_s10 + $0x8] sm:$0xf]  ;;  %v396_v22 = vperm.slane %v395_v12, 0  ;;  %v416_v24 = vadd.f32 %v730_v17, %v729_v15 }
  0x14   : > { %v380_v7 = vadd.f32 %v373_v4, %v372_v3  ;;  %v377_v20 = vsub.f32 %v373_v4, %v372_v3  ;;  %v403_v23 = vmul.f32 %v784_v14, %v401_v13  ;;  %v785_v25 = vld [vmem:[%s883_s29 + $0x4] ss:$0 sm:$0xff]  ;;  %v733_v26 = vld [vmem:[%s877_s26 + $0x6] sm:$0x1]  ;;  %v422_v27 = vadd.f32 %v732_v19, %v731_v18  ;;  %v735_v29 = vld [vmem:[%s888_s7 + $0xc] sm:$0xf] }
  0x15   : > { %v376_v21 = vmul.f32 %v375_v11, %v372_v3  ;;  %v734_v28 = vld [vmem:[%s883_s29 + $0x6] sm:$0x1]  ;;  %v736_v30 = vld [vmem:[%s893_s10 + $0xc] sm:$0xf]  ;;  %v419_v32 = vsub.f32 %v732_v19, %v731_v18  ;;  %v397_v34 = vmul.f32 %v727_v9, %v396_v22  ;;  %v417_v35 = vperm.slane %v416_v24, 0 }
  0x16   : > { %v382_v16 = vmul.f32 %v783_v2, %v380_v7  ;;  %v437_v36 = vadd.f32 %v734_v28, %v733_v26  ;;  %v786_v37 = vld [vmem:[%s883_s29 + $0x6] ss:$0 sm:$0xff]  ;;  %v787_v38 = vld [vmem:[%s877_s26] ss:$0 sm:$0xff]  ;;  %v424_v39 = vmul.f32 %v785_v25, %v422_v27  ;;  %v443_v40 = vadd.f32 %v736_v30, %v735_v29  ;;  %v788_v41 = vld [vmem:[%s877_s26 + $0x2] ss:$0 sm:$0xff] }
  0x17   : > { %v789_v42 = vld [vmem:[%s877_s26 + $0x4] ss:$0 sm:$0xff]  ;;  %v440_v43 = vsub.f32 %v736_v30, %v735_v29  ;;  %v790_v44 = vld [vmem:[%s877_s26 + $0x6] ss:$0 sm:$0xff]  ;;  %v404_v45 = vsub.f32 %v397_v34, %v403_v23  ;;  %v418_v46 = vmul.f32 %v731_v18, %v417_v35  ;;  %v379_v48 = vmul.f32 %v787_v38, %v377_v20  ;;  %v452_v49 = vld [vmem:[%s877_s26 + $0x1] sm:$0x1] }
  0x18   : > { %v383_v33 = vsub.f32 %v376_v21, %v382_v16  ;;  %v438_v47 = vperm.slane %v437_v36, 0  ;;  %v453_v50 = vld [vmem:[%s883_s29 + $0x1] sm:$0x1]  ;;  %v445_v51 = vmul.f32 %v786_v37, %v443_v40  ;;  %v400_v52 = vmul.f32 %v788_v41, %v398_v31  ;;  %v737_v62 = vld [vmem:[%s877_s26 + $0x3] sm:$0x1] }
  0x19   : > { %v421_v53 = vmul.f32 %v789_v42, %v419_v32  ;;  %v442_v54 = vmul.f32 %v790_v44, %v440_v43  ;;  %v922_v55 = vld [vmem:[%s888_s7] sm:$0xf]  ;;  %v425_v59 = vsub.f32 %v418_v46, %v424_v39  ;;  %v385_v61 = vadd.f32 %v379_v48, %v376_v21  ;;  %v739_v0 = vld [vmem:[%s888_s7 + $0x4] sm:$0xf]  ;;  %v743_v13 = vld [vmem:[%s888_s7 + $0x8] sm:$0xf] }
  0x1a   : > { %v925_v56 = vld [vmem:[%s893_s10] sm:$0xf]  ;;  %v405_v58 = vadd.f32 %v404_v45, %v383_v33  ;;  %v439_v60 = vmul.f32 %v735_v29, %v438_v47  ;;  %v406_v1 = vadd.f32 %v400_v52, %v397_v34  ;;  %v456_v3 = vadd.f32 %v453_v50, %v452_v49  ;;  %v740_v5 = vld [vmem:[%s893_s10 + $0x4] sm:$0xf]  ;;  %v744_v14 = vld [vmem:[%s893_s10 + $0x8] sm:$0xf] }
  0x1b   : > { %v791_v57 = vld [vmem:[%s883_s29 + $0x1] ss:$0 sm:$0xff]  ;;  %v738_v63 = vld [vmem:[%s883_s29 + $0x3] sm:$0x1]  ;;  %v427_v2 = vadd.f32 %v421_v53, %v418_v46  ;;  %v462_v4 = vadd.f32 %v925_v56, %v922_v55  ;;  %v741_v7 = vld [vmem:[%s877_s26 + $0x5] sm:$0x1]  ;;  %v479_v18 = vadd.f32 %v740_v5, %v739_v0  ;;  %v496_v24 = vadd.f32 %v744_v14, %v743_v13 }
  0x1c   : > { %v792_v6 = vld [vmem:[%s883_s29 + $0x3] ss:$0 sm:$0xff]  ;;  %v426_v8 = vadd.f32 %v425_v59, %v405_v58  ;;  %v446_v9 = vsub.f32 %v439_v60, %v445_v51  ;;  %v448_v10 = vadd.f32 %v442_v54, %v439_v60  ;;  %v473_v11 = vadd.f32 %v738_v63, %v737_v62  ;;  %v742_v12 = vld [vmem:[%s883_s29 + $0x5] sm:$0x1]  ;;  %v745_v20 = vld [vmem:[%s877_s26 + $0x7] sm:$0x1] }
  0x1d   : > { %v407_v15 = vadd.f32 %v406_v1, %v385_v61  ;;  %v457_v16 = vperm.slane %v456_v3, 0  ;;  %v464_v17 = vmul.f32 %v791_v57, %v462_v4  ;;  %v793_v19 = vld [vmem:[%s883_s29 + $0x5] ss:$0 sm:$0xff]  ;;  %v490_v23 = vadd.f32 %v742_v12, %v741_v7  ;;  %v746_v25 = vld [vmem:[%s883_s29 + $0x7] sm:$0x1] }
  0x1e   : > { %v447_v21 = vadd.f32 %v446_v9, %v426_v8  ;;  %v474_v22 = vperm.slane %v473_v11, 0  ;;  %v747_v26 = vld [vmem:[%s888_s7 + $0xc] sm:$0xf]  ;;  %v481_v29 = vmul.f32 %v792_v6, %v479_v18  ;;  %v507_v31 = vadd.f32 %v746_v25, %v745_v20  ;;  %v794_v32 = vld [vmem:[%s883_s29 + $0x7] ss:$0 sm:$0xff] }
  0x1f   : > { %v428_v27 = vadd.f32 %v427_v2, %v407_v15  ;;  %v458_v28 = vmul.f32 %v457_v16, %v922_v55  ;;  %v748_v30 = vld [vmem:[%s893_s10 + $0xc] sm:$0xf]  ;;  %v795_v33 = vld [vmem:[%s877_s26 + $0x1] ss:$0 sm:$0xff]  ;;  %v491_v35 = vperm.slane %v490_v23, 0  ;;  %v498_v36 = vmul.f32 %v793_v19, %v496_v24 }
  0x20   : > { %450 = vst [vmem:[%s943_s13] sm:$0xf] %v447_v21  ;;  %v475_v34 = vmul.f32 %v739_v0, %v474_v22  ;;  %v513_v37 = vadd.f32 %v748_v30, %v747_v26  ;;  %v796_v38 = vld [vmem:[%s877_s26 + $0x3] ss:$0 sm:$0xff]  ;;  %v508_v41 = vperm.slane %v507_v31, 0  ;;  %v459_v42 = vsub.f32 %v925_v56, %v922_v55  ;;  %v797_v43 = vld [vmem:[%s877_s26 + $0x5] ss:$0 sm:$0xff] }
  0x21   : > { %v449_v39 = vadd.f32 %v448_v10, %v428_v27  ;;  %v465_v40 = vsub.f32 %v458_v28, %v464_v17  ;;  %v798_v44 = vld [vmem:[%s877_s26 + $0x7] ss:$0 sm:$0xff]  ;;  %v492_v46 = vmul.f32 %v743_v13, %v491_v35  ;;  %v476_v48 = vsub.f32 %v740_v5, %v739_v0 }
  0x22   : > { %v482_v45 = vsub.f32 %v475_v34, %v481_v29  ;;  %v515_v47 = vmul.f32 %v794_v32, %v513_v37  ;;  %v509_v49 = vmul.f32 %v747_v26, %v508_v41  ;;  %v461_v50 = vmul.f32 %v795_v33, %v459_v42 }
  0x23   : > { %451 = vst [vmem:[%s958_s16] sm:$0xf] %v449_v39  ;;  %v493_v51 = vsub.f32 %v744_v14, %v743_v13  ;;  %v510_v52 = vsub.f32 %v748_v30, %v747_v26  ;;  %v499_v54 = vsub.f32 %v492_v46, %v498_v36  ;;  %v478_v57 = vmul.f32 %v796_v38, %v476_v48 }
  0x24   : > { %v483_v53 = vadd.f32 %v482_v45, %v465_v40  ;;  %v516_v58 = vsub.f32 %v509_v49, %v515_v47  ;;  %v467_v59 = vadd.f32 %v461_v50, %v458_v28 }
  0x25   : > { %v495_v60 = vmul.f32 %v797_v43, %v493_v51  ;;  %v512_v55 = vmul.f32 %v798_v44, %v510_v52  ;;  %v484_v61 = vadd.f32 %v478_v57, %v475_v34 }
  0x26   : > { %v500_v56 = vadd.f32 %v499_v54, %v483_v53 }
  0x27   : > { %v501_v62 = vadd.f32 %v495_v60, %v492_v46  ;;  %v485_v1 = vadd.f32 %v484_v61, %v467_v59  ;;  %v518_v0 = vadd.f32 %v512_v55, %v509_v49 }
  0x28   : > { %v517_v63 = vadd.f32 %v516_v58, %v500_v56 }
  0x29   : > { %v502_v2 = vadd.f32 %v501_v62, %v485_v1 }
  0x2a   : > { %749 = vst [vmem:[%s943_s13 + $0x4] sm:$0xf] %v517_v63 }
  0x2b   : > { %v519_v3 = vadd.f32 %v518_v0, %v502_v2 }
  0x2d   : > { %750 = vst [vmem:[%s958_s16 + $0x4] sm:$0xf] %v519_v3 }
  0x2e PF: > { %s16_s20 = sadd.s32 1, %s821_s20   ;;  %s983_s18 = smov %s817_s19 }
  0x2f   : > { %p13_p5 = scmp.ge.s32.totalorder %s16_s20, 6   ;;  %s984_s19 = smov %s986_s21 }
  0x31   :  { %15 = sbr.rel (!%p13_p5) target bundleno = 2 (0x2), region = 101 }

// kernel: reverse.1
= control target key start
LH: loop header
LB: loop body
LE: loop exit
PB: predicated region body
PF: predicated region fallthrough
CT: control target
= control target key end

     0   :  { %s296_s0 = inlined_call_operand.vmem [shape: f32[2,4,8,8,3], index: 0, kind: input, shape index: {}]   ;;  %s297_s1 = inlined_call_operand.vmem [shape: f32[2,4,8,8,3], index: 1, kind: output, shape index: {}]  }
   0x1   :  { %v96_v0 = vld [vmem:[%s296_s0 + $0x10] sm:$0xff]  ;;  %v99_v2 = vld [vmem:[%s296_s0 + $0x28] sm:$0xff]  ;;  %v103_v4 = vld [vmem:[%s296_s0 + $0x40] sm:$0xff] }
   0x2   :  { %v97_v1 = vld [vmem:[%s296_s0 + $0x70] sm:$0xff]  ;;  %4 = vst [vmem:[%s297_s1] sm:$0xff] %v96_v0  ;;  %v101_v3 = vld [vmem:[%s296_s0 + $0x88] sm:$0xff]  ;;  %v105_v5 = vld [vmem:[%s296_s0 + $0xa0] sm:$0xff] }
   0x3   :  { %98 = vst [vmem:[%s297_s1 + $0x60] sm:$0xff] %v97_v1  ;;  %v107_v6 = vld [vmem:[%s296_s0 + $0x58] sm:$0xff]  ;;  %v111_v8 = vld [vmem:[%s296_s0 + $0x8] sm:$0xff]  ;;  %v115_v10 = vld [vmem:[%s296_s0 + $0x20] sm:$0xff] }
   0x4   :  { %100 = vst [vmem:[%s297_s1 + $0x18] sm:$0xff] %v99_v2  ;;  %v109_v7 = vld [vmem:[%s296_s0 + $0xb8] sm:$0xff]  ;;  %v113_v9 = vld [vmem:[%s296_s0 + $0x68] sm:$0xff]  ;;  %v117_v11 = vld [vmem:[%s296_s0 + $0x80] sm:$0xff] }
   0x5   :  { %102 = vst [vmem:[%s297_s1 + $0x78] sm:$0xff] %v101_v3  ;;  %v119_v12 = vld [vmem:[%s296_s0 + $0x38] sm:$0xff]  ;;  %v123_v14 = vld [vmem:[%s296_s0 + $0x50] sm:$0xff]  ;;  %v65_v16 = vld [vmem:[%s296_s0] sm:$0xff] }
   0x6   :  { %104 = vst [vmem:[%s297_s1 + $0x30] sm:$0xff] %v103_v4  ;;  %v121_v13 = vld [vmem:[%s296_s0 + $0x98] sm:$0xff]  ;;  %v125_v15 = vld [vmem:[%s296_s0 + $0xb0] sm:$0xff]  ;;  %v128_v17 = vld [vmem:[%s296_s0 + $0x60] sm:$0xff] }
   0x7   :  { %106 = vst [vmem:[%s297_s1 + $0x90] sm:$0xff] %v105_v5  ;;  %v130_v18 = vld [vmem:[%s296_s0 + $0x18] sm:$0xff]  ;;  %v134_v20 = vld [vmem:[%s296_s0 + $0x30] sm:$0xff]  ;;  %v138_v22 = vld [vmem:[%s296_s0 + $0x48] sm:$0xff] }
   0x8   :  { %108 = vst [vmem:[%s297_s1 + $0x48] sm:$0xff] %v107_v6  ;;  %v132_v19 = vld [vmem:[%s296_s0 + $0x78] sm:$0xff]  ;;  %v136_v21 = vld [vmem:[%s296_s0 + $0x90] sm:$0xff]  ;;  %v140_v23 = vld [vmem:[%s296_s0 + $0xa8] sm:$0xff] }
   0x9   :  { %110 = vst [vmem:[%s297_s1 + $0xa8] sm:$0xff] %v109_v7 }
   0xa   :  { %112 = vst [vmem:[%s297_s1 + $0x8] sm:$0xff] %v111_v8 }
   0xb   :  { %114 = vst [vmem:[%s297_s1 + $0x68] sm:$0xff] %v113_v9 }
   0xc   :  { %116 = vst [vmem:[%s297_s1 + $0x20] sm:$0xff] %v115_v10 }
   0xd   :  { %118 = vst [vmem:[%s297_s1 + $0x80] sm:$0xff] %v117_v11 }
   0xe   :  { %120 = vst [vmem:[%s297_s1 + $0x38] sm:$0xff] %v119_v12 }
   0xf   :  { %122 = vst [vmem:[%s297_s1 + $0x98] sm:$0xff] %v121_v13 }
  0x10   :  { %124 = vst [vmem:[%s297_s1 + $0x50] sm:$0xff] %v123_v14 }
  0x11   :  { %126 = vst [vmem:[%s297_s1 + $0xb0] sm:$0xff] %v125_v15 }
  0x12   :  { %127 = vst [vmem:[%s297_s1 + $0x10] sm:$0xff] %v65_v16 }
  0x13   :  { %129 = vst [vmem:[%s297_s1 + $0x70] sm:$0xff] %v128_v17 }
  0x14   :  { %131 = vst [vmem:[%s297_s1 + $0x28] sm:$0xff] %v130_v18 }
  0x15   :  { %133 = vst [vmem:[%s297_s1 + $0x88] sm:$0xff] %v132_v19 }
  0x16   :  { %135 = vst [vmem:[%s297_s1 + $0x40] sm:$0xff] %v134_v20 }
  0x17   :  { %137 = vst [vmem:[%s297_s1 + $0xa0] sm:$0xff] %v136_v21 }
  0x18   :  { %139 = vst [vmem:[%s297_s1 + $0x58] sm:$0xff] %v138_v22 }
  0x19   :  { %141 = vst [vmem:[%s297_s1 + $0xb8] sm:$0xff] %v140_v23 }

</bundles_post_ra>
